<compile_context>
chip_gen: v7x
topology: tpu7x:2x2x1
jax: 0.10.0
libtpu: 0.0.40
codegen_flags: <defaults>
</compile_context>

<pallas_src>
import functools

import numpy as np
import jax
import jax.numpy as jnp
from jax import lax
from jax.experimental import pallas as pl
from jax.experimental.pallas import tpu as pltpu

LANES = 128  # lane-dense channel / output padding


def _round_up(x, m):
    return (x + m - 1) // m * m


# ---------------------------------------------------------------------------
# One-time probe: which way does pltpu.roll shift along lanes?
# The conv2 weight layout is built to match, so the kernel is correct either
# way the hardware rotate is defined.
# ---------------------------------------------------------------------------
_ROLL_UP = None


def _roll_probe_kernel(x_ref, o_ref):
    o_ref[...] = pltpu.roll(x_ref[...], 1, axis=1)


def _roll_moves_to_higher_lanes():
    global _ROLL_UP
    if _ROLL_UP is None:
        x = jax.lax.broadcasted_iota(jnp.float32, (8, LANES), 1)
        y = pl.pallas_call(
            _roll_probe_kernel,
            out_shape=jax.ShapeDtypeStruct((8, LANES), jnp.float32))(x)
        # jnp.roll-like convention: lane 0's value moves to lane 1 -> y[0,1]==0
        _ROLL_UP = bool(jax.device_get(y)[0, 1] == 0.0)
    return _ROLL_UP


# ---------------------------------------------------------------------------
# The fused kernel
# ---------------------------------------------------------------------------
def _lenet_kernel(x_ref, w1_ref, w2_ref, wf1_ref, wf2_ref, wf3_ref, bias_ref,
                  o_ref, p1_ref, c2_ref, p2_ref, *, B, R2P, P1TOT):
    f32 = jnp.float32
    bf16 = jnp.bfloat16
    BS = B * 144                       # pool1 rows per pool-tap block / total

    # ---- conv1 + bias + ReLU + pool1, fused (MXU) ----------------------------
    # x_ref rows: ((d,e) pool tap, image b, pool pos i*12+j); lanes: 25 conv
    # taps (padded to 32).  relu(max_tap(.) + b) == max_tap(relu(. + b)).
    b1 = bias_ref[pl.ds(0, 1), :]
    for b in range(B):
        m = None
        for tap in range(4):
            dd = jnp.dot(x_ref[pl.ds(tap * BS + b * 144, 144), :], w1_ref[...],
                         preferred_element_type=f32)            # (144, 128)
            m = dd if m is None else jnp.maximum(m, dd)
        p1_ref[pl.ds(b * 144, 144), :] = jnp.maximum(m + b1, 0.0)
    # Zero ONLY the tail rows conv2's shifted reads may touch (not the whole
    # buffer).  p1 lanes >= 6 are exactly zero (zero-padded w1/bias + relu),
    # which the conv2 lane packing below relies on.
    p1_ref[pl.ds(BS, P1TOT - BS), :] = jnp.zeros((P1TOT - BS, LANES), f32)

    # ---- conv2 + bias + ReLU: 4 K=128 MXU matmuls on roll-packed im2col ------
    # Slab lane group for tap slot tt holds pool1 channels of the row shifted
    # by dh*12+dw; two groups of taps (16 + 9) -> two K=128 weight matrices.
    # Processed in two row halves to bound live vregs (no spills).
    b2 = bias_ref[pl.ds(1, 1), :]
    n_half = R2P // 2
    for h in range(2):
        row0 = h * n_half
        acc = None
        for g, taps in enumerate((range(16), range(16, 25))):
            slab = None
            for tt, t in enumerate(taps):
                dh, dw = divmod(t, 5)
                a = p1_ref[pl.ds(row0 + dh * 12 + dw, n_half), :]   # (n_half,128)
                r = a if tt == 0 else pltpu.roll(a, 8 * tt, axis=1)
                slab = r if slab is None else slab + r
            part = jnp.dot(slab.astype(bf16), w2_ref[g],
                           preferred_element_type=f32)              # (n_half,128)
            acc = part if acc is None else acc + part
        c2_ref[pl.ds(row0, n_half), :] = jnp.maximum(acc + b2, 0.0)

    # ---- pool2: 2x2 max, stride 2 (tiny: B*16 output rows) -------------------
    # c2 row = b*144 + h2*12 + w2 ; pool2 output stored b-major: row b*16 + s,
    # s = i*4 + j  (PyTorch spatial flatten order).
    for b in range(B):
        for i in range(4):
            m = None
            for d in range(2):
                for e in range(2):
                    start = b * 144 + (2 * i + d) * 12 + e
                    v = c2_ref[pl.ds(start, 4, stride=2), :]        # (4, 128)
                    m = v if m is None else jnp.maximum(m, v)
            p2_ref[pl.ds(b * 16 + i * 4, 4), :] = m

    # ---- fc1: 256 -> 120 (+ReLU), one strided (B,128) load per spatial cell --
    hfc = jnp.zeros((B, LANES), f32)
    for s in range(16):
        act = p2_ref[pl.ds(s, B, stride=16), :]                     # (B, 128)
        hfc = hfc + jnp.dot(act[:, :16].astype(bf16), wf1_ref[s],
                            preferred_element_type=f32)
    hfc = jnp.maximum(hfc + bias_ref[pl.ds(2, 1), :], 0.0)

    # ---- fc2: 120 -> 84 (+ReLU) ----------------------------------------------
    hfc = jnp.maximum(jnp.dot(hfc.astype(bf16), wf2_ref[...],
                              preferred_element_type=f32)
                      + bias_ref[pl.ds(3, 1), :], 0.0)

    # ---- fc3: 84 -> 10 (valid logits in lanes 0..9) --------------------------
    o_ref[...] = (jnp.dot(hfc.astype(bf16), wf3_ref[...],
                          preferred_element_type=f32)
                  + bias_ref[pl.ds(4, 1), :])


# ---------------------------------------------------------------------------
# Wrapper
# ---------------------------------------------------------------------------
@jax.jit
def lenet_forward(kparams, x):
    """Fused LeNet-5 forward. x: (B, 1, 28, 28) f32 -> (B, 10) f32."""
    B = x.shape[0]
    BS = B * 144                                   # pool1 rows (12*12 per image)
    # conv2 slab rows: must cover the last c2 row pool2 reads ((B-1)*144 + 91);
    # rounded up, it always lands on a multiple of 16 (so halves stay aligned).
    R2P = _round_up((B - 1) * 144 + 92, 8)
    # p1 rows incl. headroom for the largest conv2 row shift (4*12 + 4 = 52).
    P1TOT = _round_up(R2P + 52, 8)

    # conv1 im2col: rows ordered ((d,e) pool tap, image, pool position),
    # lanes = 25 conv taps padded to 32; bf16 to halve DMA + single MXU pass.
    xx = x.astype(jnp.float32).reshape(B, 28, 28)
    patches = jnp.stack([xx[:, dh:dh + 24, dw:dw + 24]
                         for dh in range(5) for dw in range(5)],
                        axis=-1)                                    # (B,24,24,25)
    p6 = patches.reshape(B, 12, 2, 12, 2, 25)                       # [b,i,d,j,e,k]
    im2col = jnp.transpose(p6, (2, 4, 0, 1, 3, 5)).reshape(4 * BS, 25)
    im2col = jnp.pad(im2col, ((0, 0), (0, 7))).astype(jnp.bfloat16)

    kernel = functools.partial(_lenet_kernel, B=B, R2P=R2P, P1TOT=P1TOT)

    out = pl.pallas_call(
        kernel,
        out_shape=jax.ShapeDtypeStruct((B, LANES), jnp.float32),
        grid=(1,),
        in_specs=[
            pl.BlockSpec((4 * BS, 32), lambda i: (0, 0)),           # conv1 im2col
            pl.BlockSpec((32, LANES), lambda i: (0, 0)),            # conv1 weights
            pl.BlockSpec((2, LANES, LANES), lambda i: (0, 0, 0)),   # conv2 weights
            pl.BlockSpec((16, 16, LANES), lambda i: (0, 0, 0)),     # fc1 weights
            pl.BlockSpec((LANES, LANES), lambda i: (0, 0)),         # fc2 weights
            pl.BlockSpec((LANES, LANES), lambda i: (0, 0)),         # fc3 weights
            pl.BlockSpec((8, LANES), lambda i: (0, 0)),             # biases (f32)
        ],
        out_specs=pl.BlockSpec((B, LANES), lambda i: (0, 0)),
        scratch_shapes=[
            pltpu.VMEM((P1TOT, LANES), jnp.float32),    # pool1 output strip
            pltpu.VMEM((R2P, LANES), jnp.float32),      # conv2 output strip
            pltpu.VMEM((B * 16, LANES), jnp.float32),   # pool2 output (b-major)
        ],
        compiler_params=pltpu.CompilerParams(
            dimension_semantics=("arbitrary",)),
    )(im2col, kparams["w1"], kparams["w2"], kparams["wf1"],
      kparams["wf2"], kparams["wf3"], kparams["bias"])
    return out[:, :10]


# ---------------------------------------------------------------------------
# Parameters: PyTorch-style init + one-time conversion to kernel layouts
# ---------------------------------------------------------------------------
def init_params(key):
    def uniform(key, shape, fan_in):
        bound = 1.0 / jnp.sqrt(float(fan_in))
        return jax.random.uniform(key, shape, jnp.float32, -bound, bound)

    keys = jax.random.split(key, 10)
    return {
        "conv1_w": uniform(keys[0], (6, 1, 5, 5), 25),
        "conv1_b": uniform(keys[1], (6,), 25),
        "conv2_w": uniform(keys[2], (16, 6, 5, 5), 150),
        "conv2_b": uniform(keys[3], (16,), 150),
        "fc1_w": uniform(keys[4], (120, 256), 256),
        "fc1_b": uniform(keys[5], (120,), 256),
        "fc2_w": uniform(keys[6], (84, 120), 120),
        "fc2_b": uniform(keys[7], (84,), 120),
        "fc3_w": uniform(keys[8], (10, 84), 84),
        "fc3_b": uniform(keys[9], (10,), 84),
    }


def prepare_params(p):
    """One-time conversion to pre-transposed, zero-padded, lane-dense layouts.

    Matmul weights are stored bf16 (MXU operands); biases stay f32 (added to
    the f32 accumulators).  Not jitted: the conv2 packing is conditioned on the
    probed pltpu.roll direction.
    """
    bf16 = jnp.bfloat16
    f32 = jnp.float32
    sgn = 1 if _roll_moves_to_higher_lanes() else -1

    # conv1 (6,1,5,5) -> (32, 128): [tap k=dh*5+dw (25->32), cout (6->128)]
    w1 = jnp.transpose(p["conv1_w"].reshape(6, 25), (1, 0))
    w1 = jnp.pad(w1, ((0, 7), (0, LANES - 6))).astype(bf16)

    # conv2 (16,6,5,5) -> (2, 128, 128): group g = tap//16,
    # row (sgn*8*slot + cin) % 128 matches the in-kernel roll packing.
    w2_np = np.asarray(p["conv2_w"], np.float32)
    w2p = np.zeros((2, LANES, LANES), np.float32)
    for t in range(25):
        g, tt = (0, t) if t < 16 else (1, t - 16)
        dh, dw = divmod(t, 5)
        for c in range(6):
            w2p[g, (sgn * 8 * tt + c) % LANES, :16] = w2_np[:, c, dh, dw]
    w2 = jnp.asarray(w2p).astype(bf16)

    # fc1 (120, 256), input index cin*16 + s -> (16, 16, 128): [s, cin, out]
    wf1 = jnp.transpose(p["fc1_w"].reshape(120, 16, 16), (2, 1, 0))
    wf1 = jnp.pad(wf1, ((0, 0), (0, 0), (0, LANES - 120))).astype(bf16)

    # fc2 (84,120) -> (128,128) [k, n] ; fc3 (10,84) -> (128,128) [k, n]
    wf2 = jnp.pad(p["fc2_w"].T, ((0, LANES - 120), (0, LANES - 84))).astype(bf16)
    wf3 = jnp.pad(p["fc3_w"].T, ((0, LANES - 84), (0, LANES - 10))).astype(bf16)

    def padb(v):
        return jnp.pad(v.astype(f32), (0, LANES - v.shape[0]))

    bias = jnp.stack([padb(p["conv1_b"]), padb(p["conv2_b"]), padb(p["fc1_b"]),
                      padb(p["fc2_b"]), padb(p["fc3_b"]),
                      jnp.zeros((LANES,), f32), jnp.zeros((LANES,), f32),
                      jnp.zeros((LANES,), f32)], axis=0)            # (8, 128)
    return {"w1": w1, "w2": w2, "wf1": wf1, "wf2": wf2, "wf3": wf3, "bias": bias}


# ---------------------------------------------------------------------------
# Pure-JAX reference (same semantics as the PyTorch module)
# ---------------------------------------------------------------------------
def lenet_reference(params, x):
    def conv_relu(y, w, b):
        y = lax.conv_general_dilated(y, w, (1, 1), "VALID",
                                     dimension_numbers=("NCHW", "OIHW", "NCHW"))
        return jax.nn.relu(y + b[None, :, None, None])

    def maxpool(y):
        return lax.reduce_window(y, -jnp.inf, lax.max,
                                 (1, 1, 2, 2), (1, 1, 2, 2), "VALID")

    y = maxpool(conv_relu(x, params["conv1_w"], params["conv1_b"]))
    y = maxpool(conv_relu(y, params["conv2_w"], params["conv2_b"]))
    y = y.reshape(y.shape[0], -1)
    y = jax.nn.relu(y @ params["fc1_w"].T + params["fc1_b"])
    y = jax.nn.relu(y @ params["fc2_w"].T + params["fc2_b"])
    return y @ params["fc3_w"].T + params["fc3_b"]


if __name__ == "__main__":
    key = jax.random.PRNGKey(0)
    k_params, k_x = jax.random.split(key)
    params = init_params(k_params)
    kparams = prepare_params(params)          # not jitted: one-time layout prep
    x = jax.random.normal(k_x, (2, 1, 28, 28), jnp.float32)

    out = jax.block_until_ready(lenet_forward(kparams, x))
    assert out.shape == (2, 10) and out.dtype == jnp.float32

    # Check against the XLA reference.  Both paths round MXU operands to bf16
    # (kernel explicitly, reference via default TPU matmul/conv precision) while
    # keeping f32 accumulators and activations, so 5e-2 is a loose bound.
    ref = jax.block_until_ready(jax.jit(lenet_reference)(params, x))
    assert jnp.allclose(out, ref, atol=5e-2, rtol=5e-2), (
        float(jnp.max(jnp.abs(out - ref))))

    print("KERNEL_OK")
</pallas_src>

<mosaic_0001>
module attributes {stable_mosaic.version = 11 : i64} {
  func.func @_roll_probe_kernel(%arg0: memref<8x128xf32, #tpu.memory_space<vmem>>, %arg1: memref<8x128xf32, #tpu.memory_space<vmem>>) attributes {dimension_semantics = [], scalar_prefetch = 0 : i64, scratch_operands = 0 : i64, tpu.core_type = #tpu.core_type<tc>} {
    %c0 = arith.constant 0 : index
    %c0_0 = arith.constant 0 : index
    %0 = vector.load %arg0[%c0, %c0_0] : memref<8x128xf32, #tpu.memory_space<vmem>>, vector<8x128xf32>
    %c1_i32 = arith.constant 1 : i32
    %1 = tpu.dynamic_rotate %0 by %c1_i32 dim 1 : vector<8x128xf32>, i32 -> vector<8x128xf32>
    %c0_1 = arith.constant 0 : index
    %c0_2 = arith.constant 0 : index
    %2 = vector.load %arg1[%c0_1, %c0_2] : memref<8x128xf32, #tpu.memory_space<vmem>>, vector<8x128xf32>
    tpu.vector_store %arg1[%c0_1, %c0_2], %1 {strides = array<i32>} : memref<8x128xf32, #tpu.memory_space<vmem>>, vector<8x128xf32>,
    return
  }
}

</mosaic_0001>

<bundles_post_ra>
// kernel: tpu_custom_call.1
= control target key start
LH: loop header
LB: loop body
LE: loop exit
PB: predicated region body
PF: predicated region fallthrough
CT: control target
= control target key end

     0   :  { %6 = vsyncpa [#allocation3], 0  ;;  %s128_s0 = inlined_call_operand.hbm [shape: f32[8,128], index: 0, kind: input, shape index: {}]   ;;  %s129_s1 = inlined_call_operand.hbm [shape: f32[8,128], index: 1, kind: output, shape index: {}]  }
   0x1   :  { %7 = vsyncpa [#allocation4], 0  ;;  %s91_s6 = smov [#allocation2]   ;;  %s43_s10 = scalar_lea.hbm %s128_s0, 128 }
   0x2   :  { %s14_s7 = sshll.u32 %s91_s6, 4  ;;  %p44_p0 = scmp.ne.s32.totalorder %s128_s0, %s43_s10  ;;  %s15_s7 = int_to_ptr.vmem [resolvable:$true] %s14_s7 }
   0x3   :  { %p47_p1 = scmp.lt.u32.totalorder %s43_s10, %s128_s0 }
   0x5   :  { %p49_p2 = pnand %p47_p1, %p44_p0 }
   0x7   :  { %52 = shalt.err (!%p49_p2)
}
   0x8   :  { %s53_s15 = scalar_lea.vmem %s15_s7, 128  ;;  %p58_p4 = scmp.lt.s32.totalorder %s15_s7, %s15_s7 }
   0x9   :  { %p54_p3 = scmp.ne.s32.totalorder %s15_s7, %s53_s15  ;;  %p59_p5 = scmp.lt.s32.totalorder %s53_s15, %s53_s15 }
   0xb   :  { %p60_p6 = por %p59_p5, %p58_p4 }
   0xd   :  { %p61_p7 = pnand %p60_p6, %p54_p3 }
   0xf   :  { %64 = shalt.err (!%p61_p7)
}
  0x10   :  { %17 = dma.hbm_to_vmem [thread:$0]  %s128_s0, 128, %s15_s7, [#allocation3]  }
  0x11   :  { %87 = dma.done.wait [#allocation3], 128  }
  0x12   :  { %88 = vsyncadd [#allocation3], 4294967168  ;;  %v21_v0 = vld [vmem:[#allocation2] sm:$0xff]  ;;  %s92_s18 = smov 1   ;;  %s93_s19 = smov [#allocation5]  }
  0x13   :  { %22 = vrot.lane.b32.xlu0 %v21_v0, %s92_s18  ;;  %s31_s20 = sshll.u32 %s93_s19, 4  ;;  %s32_s20 = int_to_ptr.vmem [resolvable:$true] %s31_s20 }
  0x14   :  { %s65_s21 = scalar_lea.vmem %s32_s20, 128  ;;  %p70_p9 = scmp.lt.s32.totalorder %s32_s20, %s32_s20 }
  0x15   :  { %p66_p8 = scmp.ne.s32.totalorder %s32_s20, %s65_s21  ;;  %p71_p10 = scmp.lt.s32.totalorder %s65_s21, %s65_s21 }
  0x17   :  { %p72_p11 = por %p71_p10, %p70_p9 }
  0x19   :  { %p73_p12 = pnand %p72_p11, %p66_p8 }
  0x85   :  { %v23_v1 = vpop.permute.xlu0 %22 }
  0x86   :  { %24 = vst [vmem:[#allocation5] sm:$0xff] %v23_v1 }
  0x87   :  { %76 = shalt.err (!%p73_p12)
}
  0x88   :  { %s77_s0 = scalar_lea.hbm %s129_s1, 128 }
  0x89   :  { %p78_p13 = scmp.ne.s32.totalorder %s129_s1, %s77_s0  ;;  %p81_p0 = scmp.lt.u32.totalorder %s77_s0, %s129_s1 }
  0x8b   :  { %p83_p1 = pnand %p81_p0, %p78_p13 }
  0x8d   :  { %86 = shalt.err (!%p83_p1)
}
  0x8e   :  { %34 = dma.vmem_to_hbm [thread:$0]  %s32_s20, 128, %s129_s1, [#allocation4]  }
  0x8f   :  { %89 = dma.done.wait [#allocation4], 128  }
  0x90   :  { %90 = vsyncadd [#allocation4], 4294967168 }
  0x91   :  { %38 = vsyncpa [#allocation3], 1 }
  0x92   :  { %39 = vsyncpa [#allocation4], 1 }

</bundles_post_ra>
